<compile_context>
chip_gen: v5e
topology: v5e:2x2
jax: 0.10.0
libtpu: 0.0.40
codegen_flags: <defaults>
</compile_context>

<pallas_src>
from functools import partial

import jax
import jax.numpy as jnp
from jax.experimental import pallas as pl
from jax.experimental.pallas import tpu as pltpu


def _lraspp_kernel(x_ref, w1_ref, scale_ref, bias_ref, y_ref, xsum_ref, *,
                   matmul_dtype):
    # x_ref:     (1, Cin, THW)   input dtype (f32 or bf16) — one HW tile
    # w1_ref:    (Cout, Cin)     bf16   aspp1 1x1-conv weight (resident)
    # scale_ref: (Cout, 1)       f32    folded BN scale
    # bias_ref:  (Cout, 1)       f32    folded BN bias
    # y_ref:     (1, Cout, THW)  bf16   un-gated aspp1 output tile
    # xsum_ref:  (1, Cin, 1)     f32    per-channel sums (accumulated over HW)
    x = x_ref[0]                                                   # (Cin, THW)

    # Channel-sum partial for the aspp2 global-average branch (f32 accumulate).
    @pl.when(pl.program_id(1) == 0)
    def _():
        xsum_ref[...] = jnp.zeros_like(xsum_ref)

    xsum_ref[0] += jnp.sum(x.astype(jnp.float32), axis=-1, keepdims=True)

    # 1x1 conv as an MXU matmul: bf16 operands (cast in VMEM), f32 accumulation.
    y = jnp.dot(w1_ref[...], x.astype(matmul_dtype),
                preferred_element_type=jnp.float32)                # (Cout, THW)
    y = y * scale_ref[...] + bias_ref[...]                         # folded BN
    y_ref[0] = jnp.maximum(y, 0.0).astype(y_ref.dtype)             # ReLU, bf16 store


def _pick_hw_tile(hw_pad, max_lanes, target_lanes=8192):
    """Largest multiple of 128 dividing hw_pad, <= min(target, max_lanes)."""
    cap = max(128, min(hw_pad, target_lanes, max_lanes))
    t = (cap // 128) * 128
    while hw_pad % t:
        t -= 128
    return t


def _vmem_plan(cin, cout, hw_pad, x_itemsize, y_itemsize, w_itemsize, thw=None):
    """Pick the HW tile and the scoped-VMEM request from real chip capacity."""
    try:
        cap = int(pltpu.get_tpu_info().vmem_capacity_bytes)
    except Exception:  # conservative fallback (v7x per-TC physical VMEM)
        cap = 64 << 20
    budget = int(cap * 0.75)                      # ~25% headroom for compiler scratch
    # Resident / tiny buffers: W1 (bf16), BN scale/bias, channel-sum block.
    static = 2 * cout * cin * w_itemsize + 4 * cout * 4 + 2 * cin * 4
    # Double-buffered streaming tiles (x in, y out) per lane of THW.
    per_lane = 2 * (cin * x_itemsize + cout * y_itemsize)
    if thw is None:
        max_lanes = max(128, (budget - static - (2 << 20)) // per_lane)
        thw = _pick_hw_tile(hw_pad, max_lanes)
    need = static + per_lane * thw + (4 << 20)
    vmem_limit = int(min(max(need, 16 << 20), budget))
    return thw, vmem_limit


def lraspp_pallas(x_nchw, w1_oi, w2_oi, bn_gamma, bn_beta, bn_mean, bn_var,
                  eps=1e-5, thw=None, matmul_dtype=jnp.bfloat16,
                  inter_dtype=jnp.bfloat16, out_dtype=None):
    """x_nchw: (N, Cin, H, W) (f32 or bf16 — no wrapper cast pass is done);
    w*_oi: (Cout, Cin) = Conv2d(.,.,1).weight[:, :, 0, 0]."""
    n, cin, h, w = x_nchw.shape
    cout = w1_oi.shape[0]
    hw = h * w
    if out_dtype is None:
        out_dtype = x_nchw.dtype

    # Channels-major (N, Cin, HW): a pure reshape of NCHW — no transpose / copy.
    x = x_nchw.reshape(n, cin, hw)

    # Pad HW up to a multiple of 128 so blocks stay lane-aligned (unmasked
    # stores). Zero padding adds 0 to the channel sums; padded output columns
    # are sliced off below.
    hw_pad = -(-hw // 128) * 128
    if hw_pad != hw:
        x = jnp.pad(x, ((0, 0), (0, 0), (0, hw_pad - hw)))

    w1 = w1_oi.astype(matmul_dtype)                                # (Cout, Cin), tiny

    # Fold inference-mode BatchNorm into a per-channel affine (f32).
    scale = bn_gamma.astype(jnp.float32) / jnp.sqrt(bn_var.astype(jnp.float32) + eps)
    bias = bn_beta.astype(jnp.float32) - bn_mean.astype(jnp.float32) * scale
    scale = scale.reshape(cout, 1)
    bias = bias.reshape(cout, 1)

    x_is = jnp.dtype(x.dtype).itemsize
    y_is = jnp.dtype(inter_dtype).itemsize
    w_is = jnp.dtype(matmul_dtype).itemsize
    thw, vmem_limit = _vmem_plan(cin, cout, hw_pad, x_is, y_is, w_is, thw)
    assert hw_pad % thw == 0, "HW tile must divide padded H*W"
    n_hw_tiles = hw_pad // thw

    flops = 2 * n * cin * cout * hw_pad
    bytes_accessed = (n * cin * hw_pad * x_is + cout * cin * w_is
                      + n * cout * hw_pad * y_is + n * cin * 4)

    # NOTE: deeper input buffering (pipeline_mode=pl.Buffered(3)) is a further
    # low-single-digit-% option once tiles are large; left at the default here.
    y, xsum = pl.pallas_call(
        partial(_lraspp_kernel, matmul_dtype=matmul_dtype),
        out_shape=(jax.ShapeDtypeStruct((n, cout, hw_pad), inter_dtype),
                   jax.ShapeDtypeStruct((n, cin, 1), jnp.float32)),
        grid_spec=pltpu.PrefetchScalarGridSpec(
            num_scalar_prefetch=0,
            grid=(n, n_hw_tiles),
            in_specs=[
                pl.BlockSpec((1, cin, thw), lambda i, j: (i, 0, j)),   # x tile
                pl.BlockSpec((cout, cin), lambda i, j: (0, 0)),        # W1 (resident)
                pl.BlockSpec((cout, 1), lambda i, j: (0, 0)),          # BN scale
                pl.BlockSpec((cout, 1), lambda i, j: (0, 0)),          # BN bias
            ],
            out_specs=[
                pl.BlockSpec((1, cout, thw), lambda i, j: (i, 0, j)),  # un-gated aspp1
                pl.BlockSpec((1, cin, 1), lambda i, j: (i, 0, 0)),     # channel sums
            ],
        ),
        compiler_params=pltpu.CompilerParams(
            # hw axis carries the channel-sum accumulator => "arbitrary";
            # batch axis is independent => "parallel".
            dimension_semantics=("parallel", "arbitrary"),
            vmem_limit_bytes=vmem_limit,
        ),
        cost_estimate=pl.CostEstimate(flops=int(flops), transcendentals=0,
                                      bytes_accessed=int(bytes_accessed)),
    )(x, w1, scale, bias)

    # aspp2 tail: global mean -> 1x1 conv -> sigmoid (tiny: O(N*Cin*Cout)).
    mean = xsum[:, :, 0] / jnp.float32(hw)                         # true HW (pad adds 0)
    gate = jax.nn.sigmoid(mean @ w2_oi.astype(jnp.float32).T)      # (N, Cout), f32

    # Per-(n, cout) gate over the (much smaller) Cout*HW output stream.
    out = (y.astype(jnp.float32) * gate[:, :, None])[:, :, :hw].astype(out_dtype)
    return out.reshape(n, cout, h, w)


def lraspp_reference(x_nchw, w1_oi, w2_oi, bn_gamma, bn_beta, bn_mean, bn_var,
                     eps=1e-5, matmul_dtype=jnp.float32, inter_dtype=jnp.float32):
    """Pure-JAX reference mirroring the PyTorch forward (inference-mode BN).

    matmul_dtype / inter_dtype let us build a precision-matched reference for
    the bf16-matmul / bf16-intermediate kernel path."""
    xf = x_nchw.astype(jnp.float32)
    y = jnp.einsum("nchw,oc->nohw",
                   x_nchw.astype(matmul_dtype), w1_oi.astype(matmul_dtype),
                   preferred_element_type=jnp.float32)
    scale = bn_gamma / jnp.sqrt(bn_var + eps)
    bias = bn_beta - bn_mean * scale
    y = y * scale[None, :, None, None] + bias[None, :, None, None]
    y = jnp.maximum(y, 0.0).astype(inter_dtype).astype(jnp.float32)
    m = jnp.mean(xf, axis=(2, 3))                                  # (N, Cin)
    g = jax.nn.sigmoid(m @ w2_oi.astype(jnp.float32).T)            # (N, Cout)
    return y * g[:, :, None, None]


if __name__ == "__main__":
    key = jax.random.PRNGKey(0)
    k_x, k_w1, k_w2, k_g, k_b, k_m, k_v = jax.random.split(key, 7)

    N, Cin, H, W = 2, 4, 16, 16
    Cout = 8

    x = jax.random.normal(k_x, (N, Cin, H, W), dtype=jnp.float32)
    w1 = jax.random.normal(k_w1, (Cout, Cin), dtype=jnp.float32) * 0.1  # Conv2d weight[:, :, 0, 0]
    w2 = jax.random.normal(k_w2, (Cout, Cin), dtype=jnp.float32) * 0.1
    bn_gamma = 1.0 + 0.05 * jax.random.normal(k_g, (Cout,), dtype=jnp.float32)
    bn_beta = 0.05 * jax.random.normal(k_b, (Cout,), dtype=jnp.float32)
    bn_mean = 0.05 * jax.random.normal(k_m, (Cout,), dtype=jnp.float32)
    bn_var = jnp.abs(1.0 + 0.05 * jax.random.normal(k_v, (Cout,), dtype=jnp.float32))

    # thw=128 exercises the tiled grid (grid = (2, 2)) even at this small size.
    out = lraspp_pallas(x, w1, w2, bn_gamma, bn_beta, bn_mean, bn_var, thw=128)
    out = jax.block_until_ready(out)
    assert out.shape == (N, Cout, H, W)

    # Precision-matched reference (bf16 matmul operands, bf16 un-gated store,
    # f32 accumulation / gate) — validates the kernel logic tightly.
    ref_matched = lraspp_reference(x, w1, w2, bn_gamma, bn_beta, bn_mean, bn_var,
                                   matmul_dtype=jnp.bfloat16, inter_dtype=jnp.bfloat16)
    assert jnp.allclose(out, ref_matched, atol=1e-3, rtol=1e-3), \
        "mismatch vs precision-matched reference"

    # Loose sanity check vs the full-precision PyTorch-equivalent math
    # (difference is only bf16 rounding of x / W1 / the un-gated activation).
    ref_f32 = lraspp_reference(x, w1, w2, bn_gamma, bn_beta, bn_mean, bn_var)
    assert jnp.allclose(out, ref_f32, atol=5e-2, rtol=5e-2), "mismatch vs f32 reference"

    print("KERNEL_OK")
</pallas_src>

<mosaic_0001>
module attributes {stable_mosaic.version = 11 : i64} {
  func.func @_lraspp_kernel(%arg0: i32, %arg1: i32, %arg2: memref<1x4x128xf32, #tpu.memory_space<vmem>>, %arg3: memref<8x4xbf16, #tpu.memory_space<vmem>>, %arg4: memref<8x1xf32, #tpu.memory_space<vmem>>, %arg5: memref<8x1xf32, #tpu.memory_space<vmem>>, %arg6: memref<1x8x128xbf16, #tpu.memory_space<vmem>>, %arg7: memref<1x4x1xf32, #tpu.memory_space<vmem>>) attributes {dimension_semantics = [#tpu.dimension_semantics<parallel>, #tpu.dimension_semantics<arbitrary>], iteration_bounds = array<i64: 2, 2>, scalar_prefetch = 0 : i64, scratch_operands = 0 : i64, tpu.core_type = #tpu.core_type<tc>, window_params = [{transform_indices = @transform_0, window_bounds = array<i64: 1, 4, 128>}, {pipeline_mode = #tpu.pipeline_mode<synchronous>, transform_indices = @transform_1, window_bounds = array<i64: 8, 4>}, {pipeline_mode = #tpu.pipeline_mode<synchronous>, transform_indices = @transform_2, window_bounds = array<i64: 8, 1>}, {pipeline_mode = #tpu.pipeline_mode<synchronous>, transform_indices = @transform_3, window_bounds = array<i64: 8, 1>}, {transform_indices = @transform_4, window_bounds = array<i64: 1, 8, 128>}, {transform_indices = @transform_5, window_bounds = array<i64: 1, 4, 1>}]} {
    %c0 = arith.constant 0 : index
    %c0_0 = arith.constant 0 : index
    %c0_1 = arith.constant 0 : index
    %0 = vector.load %arg2[%c0, %c0_0, %c0_1] : memref<1x4x128xf32, #tpu.memory_space<vmem>>, vector<1x4x128xf32>
    %1 = vector.shape_cast %0 : vector<1x4x128xf32> to vector<4x128xf32>
    %c0_i32 = arith.constant 0 : i32
    %2 = arith.cmpi eq, %arg1, %c0_i32 : i32
    %3 = arith.extui %2 : i1 to i32
    %c0_i32_2 = arith.constant 0 : i32
    %4 = arith.cmpi ne, %3, %c0_i32_2 : i32
    scf.if %4 {
      %cst_20 = arith.constant 0.000000e+00 : f32
      %28 = vector.broadcast %cst_20 : f32 to vector<1x4x1xf32>
      %c0_21 = arith.constant 0 : index
      %c0_22 = arith.constant 0 : index
      %c0_23 = arith.constant 0 : index
      %29 = vector.load %arg7[%c0_21, %c0_22, %c0_23] : memref<1x4x1xf32, #tpu.memory_space<vmem>>, vector<1x4x1xf32>
      tpu.vector_store %arg7[%c0_21, %c0_22, %c0_23], %28 {strides = array<i32>} : memref<1x4x1xf32, #tpu.memory_space<vmem>>, vector<1x4x1xf32>,
    } else {
    }
    %c0_3 = arith.constant 0 : index
    %c0_4 = arith.constant 0 : index
    %c0_5 = arith.constant 0 : index
    %5 = vector.load %arg7[%c0_3, %c0_4, %c0_5] : memref<1x4x1xf32, #tpu.memory_space<vmem>>, vector<1x4x1xf32>
    %6 = vector.shape_cast %5 : vector<1x4x1xf32> to vector<4x1xf32>
    %cst = arith.constant dense<0.000000e+00> : vector<4xf32>
    %7 = vector.multi_reduction <add>, %1, %cst [1] : vector<4x128xf32> to vector<4xf32>
    %8 = vector.shape_cast %7 : vector<4xf32> to vector<4x1xf32>
    %9 = arith.addf %6, %8 : vector<4x1xf32>
    %c0_6 = arith.constant 0 : index
    %c0_7 = arith.constant 0 : index
    %c0_8 = arith.constant 0 : index
    %10 = vector.load %arg7[%c0_6, %c0_7, %c0_8] : memref<1x4x1xf32, #tpu.memory_space<vmem>>, vector<1x4x1xf32>
    %11 = vector.shape_cast %10 : vector<1x4x1xf32> to vector<4x1xf32>
    %12 = vector.shape_cast %9 : vector<4x1xf32> to vector<1x4x1xf32>
    tpu.vector_store %arg7[%c0_6, %c0_7, %c0_8], %12 {strides = array<i32>} : memref<1x4x1xf32, #tpu.memory_space<vmem>>, vector<1x4x1xf32>,
    %c0_9 = arith.constant 0 : index
    %c0_10 = arith.constant 0 : index
    %13 = vector.load %arg3[%c0_9, %c0_10] : memref<8x4xbf16, #tpu.memory_space<vmem>>, vector<8x4xbf16>
    %14 = arith.truncf %1 : vector<4x128xf32> to vector<4x128xbf16>
    %cst_11 = arith.constant dense<0.000000e+00> : vector<8x128xf32>
    %15 = tpu.matmul %13, %14, %cst_11 {dimension_numbers = #tpu.dot_dimension_numbers<[1], [0], [0], [1], [0, 0, 1, 1], [], []>} : vector<8x4xbf16>, vector<4x128xbf16>, vector<8x128xf32> -> vector<8x128xf32>
    %c0_12 = arith.constant 0 : index
    %c0_13 = arith.constant 0 : index
    %16 = vector.load %arg4[%c0_12, %c0_13] : memref<8x1xf32, #tpu.memory_space<vmem>>, vector<8x1xf32>
    %17 = vector.broadcast %16 : vector<8x1xf32> to vector<8x128xf32>
    %18 = arith.mulf %15, %17 : vector<8x128xf32>
    %c0_14 = arith.constant 0 : index
    %c0_15 = arith.constant 0 : index
    %19 = vector.load %arg5[%c0_14, %c0_15] : memref<8x1xf32, #tpu.memory_space<vmem>>, vector<8x1xf32>
    %20 = vector.broadcast %19 : vector<8x1xf32> to vector<8x128xf32>
    %21 = arith.addf %18, %20 : vector<8x128xf32>
    %cst_16 = arith.constant 0.000000e+00 : f32
    %22 = vector.broadcast %cst_16 : f32 to vector<8x128xf32>
    %23 = arith.maximumf %21, %22 : vector<8x128xf32>
    %24 = arith.truncf %23 : vector<8x128xf32> to vector<8x128xbf16>
    %c0_17 = arith.constant 0 : index
    %c0_18 = arith.constant 0 : index
    %c0_19 = arith.constant 0 : index
    %25 = vector.load %arg6[%c0_17, %c0_18, %c0_19] : memref<1x8x128xbf16, #tpu.memory_space<vmem>>, vector<1x8x128xbf16>
    %26 = vector.shape_cast %25 : vector<1x8x128xbf16> to vector<8x128xbf16>
    %27 = vector.shape_cast %24 : vector<8x128xbf16> to vector<1x8x128xbf16>
    tpu.vector_store %arg6[%c0_17, %c0_18, %c0_19], %27 {strides = array<i32>} : memref<1x8x128xbf16, #tpu.memory_space<vmem>>, vector<1x8x128xbf16>,
    return
  }
  func.func @transform_0(%arg0: i32, %arg1: i32) -> (i32, i32, i32) {
    %c0_i32 = arith.constant 0 : i32
    %c0_i32_0 = arith.constant 0 : i32
    return %arg0, %c0_i32, %arg1 : i32, i32, i32
  }
  func.func @transform_1(%arg0: i32, %arg1: i32) -> (i32, i32) {
    %c0_i32 = arith.constant 0 : i32
    %c0_i32_0 = arith.constant 0 : i32
    %c0_i32_1 = arith.constant 0 : i32
    return %c0_i32, %c0_i32_0 : i32, i32
  }
  func.func @transform_2(%arg0: i32, %arg1: i32) -> (i32, i32) {
    %c0_i32 = arith.constant 0 : i32
    %c0_i32_0 = arith.constant 0 : i32
    %c0_i32_1 = arith.constant 0 : i32
    return %c0_i32, %c0_i32_0 : i32, i32
  }
  func.func @transform_3(%arg0: i32, %arg1: i32) -> (i32, i32) {
    %c0_i32 = arith.constant 0 : i32
    %c0_i32_0 = arith.constant 0 : i32
    %c0_i32_1 = arith.constant 0 : i32
    return %c0_i32, %c0_i32_0 : i32, i32
  }
  func.func @transform_4(%arg0: i32, %arg1: i32) -> (i32, i32, i32) {
    %c0_i32 = arith.constant 0 : i32
    %c0_i32_0 = arith.constant 0 : i32
    return %arg0, %c0_i32, %arg1 : i32, i32, i32
  }
  func.func @transform_5(%arg0: i32, %arg1: i32) -> (i32, i32, i32) {
    %c0_i32 = arith.constant 0 : i32
    %c0_i32_0 = arith.constant 0 : i32
    %c0_i32_1 = arith.constant 0 : i32
    return %arg0, %c0_i32, %c0_i32_0 : i32, i32, i32
  }
}

</mosaic_0001>

<bundles_post_ra>
// kernel: tpu_custom_call.1
= control target key start
LH: loop header
LB: loop body
LE: loop exit
PB: predicated region body
PF: predicated region fallthrough
CT: control target
= control target key end

     0   :  { %11 = vsyncpa [#allocation3], 0  ;;  %s811_s0 = inlined_call_operand.vmem [shape: f32[2,4,256], index: 0, kind: input, shape index: {}]   ;;  %s812_s1 = inlined_call_operand.vmem [shape: bf16[8,4], index: 1, kind: input, shape index: {}]   ;;  %s813_s2 = inlined_call_operand.vmem [shape: f32[8,1], index: 2, kind: input, shape index: {}]   ;;  %s814_s3 = inlined_call_operand.vmem [shape: f32[8,1], index: 3, kind: input, shape index: {}]   ;;  %s815_s4 = inlined_call_operand.hbm [shape: bf16[2,8,256], index: 4, kind: output, shape index: {0}]   ;;  %s816_s5 = inlined_call_operand.vmem [shape: f32[2,4,1], index: 5, kind: output, shape index: {1}]  }
   0x1   :  { %13 = vsyncpa [#allocation3 + $0x1], 0  ;;  %s660_s18 = smov 0   ;;  %s662_s19 = smov 0  }
   0x2   :  { %s664_s20 = smov 0   ;;  %s666_s21 = smov 0  }
   0x3   :  { %s668_s22 = smov 0   ;;  %s670_s23 = smov 0  }
   0x4   :  { %s672_s24 = smov 0   ;;  %s674_s25 = smov 0  }
   0x5 LB: > { %s442_s26 = sadd.s32 4294967295, %s626_s25   ;;  %s443_s27 = sadd.s32 4294967294, %s626_s25   ;;  %s626_s25 = sphi %s674_s25, %s19_s25   ;;  %s622_s24 = sphi %s672_s24, %s833_s24   ;;  %s618_s23 = sphi %s670_s23, %s832_s23   ;;  %s614_s22 = sphi %s668_s22, %s831_s22   ;;  %s610_s21 = sphi %s666_s21, %s830_s21   ;;  %s606_s20 = sphi %s664_s20, %s829_s20   ;;  %s602_s19 = sphi %s662_s19, %s828_s19   ;;  %s598_s18 = sphi %s660_s18, %s827_s18  }
   0x6   : > { %s28_s28 = sadd.s32 1, %s618_s23  ;;  %s31_s29 = sadd.s32 1, %s622_s24 }
   0x7   : > { %p29_p0 = scmp.ge.s32.totalorder %s28_s28, 2  ;;  %p141_p1 = scmp.ne.s32.totalorder %s606_s20, %s602_s19 }
   0x8   : > { %p142_p2 = scmp.eq.s32.totalorder %s442_s26, 3  ;;  %p147_p5 = scmp.ne.s32.totalorder %s602_s19, %s598_s18 }
   0x9   : > { %s835_s28 = smov (%p29_p0, %s28_s28), 0  ;;  %s837_s29 = smov (!%p29_p0, %s31_s29), %s622_s24 }
   0xa   : > { %820 = sst [smem:[#allocation5_spill]] %s835_s28  ;;  %s127_s30 = ssub.s32 %s618_s23, %s835_s28 }
   0xb   : > { %p711_p3 = por %p142_p2, %p141_p1  ;;  %p33_p4 = scmp.ge.s32.totalorder %s837_s29, 2 }
   0xc   : > { %p148_p6 = scmp.eq.s32.totalorder %s443_s27, 3  ;;  %p446_p7 = scmp.ge.s32.totalorder %s626_s25, 1 }
   0xd   : > { %s839_s29 = smov (%p33_p4, %s837_s29), 0  ;;  %p212_p9 = scmp.lt.s32.totalorder %s626_s25, 5 }
   0xe   : > { %822 = sst [smem:[#allocation6_spill]] %s839_s29  ;;  %p720_p8 = por %p148_p6, %p147_p5 }
   0xf   : > { %s126_s8 = ssub.s32 %s622_s24, %s839_s29  ;;  %s131_s9 = sadd.s32 1, %s606_s20 }
  0x10   : > { %s128_s10 = sor.u32 %s127_s30, %s126_s8  ;;  %p213_p10 = pnand %p446_p7, %p212_p9 }
  0x11   : > { %p129_p11 = scmp.eq.s32.totalorder %s128_s10, 0  ;;  %s819_s12 = sand.u32 (!%p213_p10), 1, %s602_s19  }
  0x12   : > { %216 = sbr.rel (%p213_p10) target bundleno = 177 (0xb1), region = 36  ;;  %p247_p12 = scmp.lt.s32.totalorder (!%p213_p10), %s614_s22, 1 }
  0x13   : > { %s729_s11 = scalar_select %p129_p11, %s606_s20, %s131_s9  }
  0x14   : > { %s735_s13 = sshll.u32 (!%p213_p10), %s819_s12, 2  ;;  %p249_p13 = scmp.lt.s32.totalorder (!%p213_p10), %s610_s21, 1 }
  0x15   : > { %s240_s12 = scalar_lea.vmem (!%p213_p10), [#allocation2], %s735_s13  ;;  %p451_p0 = scmp.ne.s32.totalorder (!%p213_p10), %s610_s21, 0 }
  0x17   : > { %s248_s14 = scalar_select %p247_p12, %s614_s22, 1 }
  0x18   : > { %s250_s15 = scalar_select %p249_p13, %s610_s21, 1 }
  0x19   : > { %s448_s16 = sshll.u32 %s248_s14, 1  ;;  %s450_s17 = sshll.u32 %s248_s14, 2 }
  0x1a   : > { %s252_s26 = sadd.s32 %s448_s16, %s250_s15  ;;  %s743_s8 = scalar_lea.vmem %s816_s5, %s450_s17 }
  0x1b   : > { %s449_s9 = sshll.u32 %s252_s26, 2  ;;  %264 = sbr.rel (%p451_p0) target bundleno = 34 (0x22), region = 40 }
  0x1c   : > { %s254_s28 = scalar_lea.vmem %s811_s0, %s449_s9 }
  0x1d   : > { %v260_v0 = vld [vmem:[%s254_s28] sm:$0xf] }
  0x20   : > { %vm265_vm0 = vcmask 3072   ;;  %v628_v1 = vmov 0.0  }
  0x21   : > { %266 = vst.msk [vmem:[%s743_s8] sm:$0xf] %vm265_vm0, %v628_v1 }
  0x22 PF: > { %v298_v2 = vld [vmem:[%s813_s2] sm:$0xff]  ;;  %v276_v3 = vpack.c.bf16 %v260_v0, %v260_v0  ;;  %vm281_vm1 = vcmask 1041408   ;;  %v629_v4 = vmov 0   ;;  %vm268_vm2 = vcmask 1043456   ;;  %s454_s26 = sshll.u32 %s614_s22, 1  ;;  %s334_s15 = sshll.u32 %s240_s12, 4  ;;  %s335_s15 = int_to_ptr.vmem [resolvable:$true] %s334_s15 }
  0x23   : > { %531 = vset.pattern.permute.xlu0 %v629_v4  ;;  %v269_v6 = vsel %vm268_vm2, %v260_v0, 0.0  ;;  %v275_v7 = vld [vmem:[%s812_s1] sm:$0xf]  ;;  %vm277_vm3 = vcmask 31744   ;;  %vm273_vm4 = vcmask 3072   ;;  %s330_s27 = sadd.s32 %s610_s21, %s454_s26  ;;  %s824_s21 = sand.u32 1, %s602_s19  }
  0x24   : > { %301 = vperm.xlu0 %531, %v298_v2   ;;  %v283_v5 = vsel %vm281_vm1, %v276_v3, 0  ;;  %270 = vadd.xlane.f32.xlu1 %v269_v6  ;;  %v305_v8 = vld [vmem:[%s814_s3] sm:$0xff]  ;;  %s455_s30 = sshll.u32 %s330_s27, 2  ;;  %s316_s22 = scalar_lea.sflag [#allocation3], %s824_s21 }
  0x25   : > { %292 = vmatpush.bf16.msra.mxu0 %v283_v5  ;;  %s332_s14 = scalar_lea.hbm %s815_s4, %s455_s30  ;;  %s552_s26 = scalar_lea.hbm %s815_s4, 16 }
  0x26   : > { %s336_s28 = sshll.u32 %s332_s14, 4  ;;  %s337_s28 = int_to_ptr.hbm [resolvable:$true] %s336_s28 }
  0x28   : > { %452 = vmatmul.msk.bf16.vlgmr.msra.gmra.mxu0 %vm277_vm3, %v275_v7  ;;  %v267_v9 = vld [vmem:[%s743_s8] sm:$0xf] }
  0x2c   : > { %308 = vperm.xlu0 %531, %v305_v8  }
  0x96   : > { %v302_v12 = vpop.permute.xlu0 %301 }
  0x97   : > { %v271_v10 = vpop.xlane.xlu1 %270 }
  0x98   : > { %v272_v11 = vadd.f32 %v271_v10, %v267_v9 }
  0x9a   : > { %274 = vst.msk [vmem:[%s743_s8] sm:$0xf] %vm273_vm4, %v272_v11  ;;  %s546_s8 = sshra.s32 %s337_s28, 4  ;;  %s547_s8 = int_to_ptr.hbm [resolvable:$true] %s546_s8 }
  0x9b   : > { %s548_s29 = scalar_lea.hbm %s547_s8, 4  ;;  %p553_p5 = scmp.lt.s32.totalorder %s547_s8, %s815_s4 }
  0x9c   : > { %p549_p1 = scmp.ne.s32.totalorder %s547_s8, %s548_s29  ;;  %p554_p6 = scmp.lt.s32.totalorder %s552_s26, %s548_s29 }
  0x9e   : > { %v309_v15 = vpop.permute.xlu0 %308  ;;  %p550_p2 = pnand %p549_p1, %p711_p3  ;;  %p555_p7 = por %p554_p6, %p553_p5 }
  0xa0   : > { %p551_p4 = pneg %p550_p2 }
  0xa2   : > { %p556_p9 = pnand %p555_p7, %p551_p4 }
  0xa5   : > { %v294_v13 = vpop.f32.mrf.mxu0 }
  0xa6   : > { %v304_v14 = vmul.f32 %v302_v12, %v294_v13 }
  0xa8   : > { %v311_v16 = vadd.f32 %v309_v15, %v304_v14 }
  0xaa   : > { %v312_v17 = vmax.f32 %v311_v16, 0.0 }
  0xac   : > { %v313_v18 = vpack.c.bf16 %v312_v17, %v312_v17 }
  0xad   : > { %v296_v19 = vpop.f32.mrf.mxu0 }
  0xae   : > { %314 = vst [vmem:[%s240_s12] sm:$0xf] %v313_v18 }
  0xaf   : > { %559 = shalt.err (!%p556_p9)
}
  0xb0   : > { %458 = dma.vmem_to_hbm [thread:$0]  (%p711_p3), %s335_s15, 64, %s337_s28, %s316_s22  }
  0xb1 PF: > { %p464_p10 = scmp.ge.s32.totalorder %s626_s25, 2  ;;  %s351_s12 = sand.u32 1, %s598_s18  }
  0xb2   : > { %s352_s13 = scalar_lea.sflag [#allocation3], %s351_s12 }
  0xb3   : > { %p461_p11 = pnand %p464_p10, %p720_p8 }
  0xb5   : > { %p462_p12 = pneg %p461_p11 }
  0xb7   : > { %593 = dma.done.wait (%p462_p12), %s352_s13, 64  }
  0xb8   : > { %595 = vsyncadd (%p462_p12), %s352_s13, 4294967232  ;;  %s19_s25 = sadd.s32 1, %s626_s25   ;;  %s825_s6 = sld [smem:[#allocation5_spill]] }
  0xb9   : > { %p16_p13 = scmp.ge.s32.totalorder %s19_s25, 6   ;;  %s826_s9 = sld [smem:[#allocation6_spill]] }
  0xba   : > { %s827_s18 = smov %s602_s19  ;;  %s828_s19 = smov %s606_s20 }
  0xbb   : > { %s829_s20 = smov %s729_s11  ;;  %s830_s21 = smov %s618_s23 }
  0xbc   : > { %s831_s22 = smov %s622_s24  ;;  %18 = sbr.rel (!%p16_p13) target bundleno = 5 (0x5), region = 87 }
  0xbe   : > { %s832_s23 = smov %s825_s6 }
  0xbf   : > { %s833_s24 = smov %s826_s9 }
  0xc1   :  { %365 = vsyncpa [#allocation3], 1 }
  0xc2   :  { %367 = vsyncpa [#allocation3 + $0x1], 1 }

</bundles_post_ra>
